<compile_context>
chip_gen: v7x
topology: tpu7x:2x2x1
jax: 0.10.0
libtpu: 0.0.40
codegen_flags: <defaults>
</compile_context>

<pallas_src>
import functools

import jax
import jax.numpy as jnp
from jax.experimental import pallas as pl
from jax.experimental.pallas import tpu as pltpu


def _round_up(x: int, m: int) -> int:
    return ((x + m - 1) // m) * m


def _row_align(dtype) -> int:
    """Sublane packing granularity for the second-minor dim."""
    itemsize = jnp.dtype(dtype).itemsize
    if itemsize >= 4:
        return 8
    if itemsize == 2:
        return 16
    return 32


# --------------------------------------------------------------------------
# Kernel body: x[tb,tk] @ w[tk,tn] + b[1,tn], f32 accumulator over the K grid.
# --------------------------------------------------------------------------
def _make_linear_kernel(activation: str, negative_slope: float,
                        use_bf16_mxu: bool):
    def kernel(x_ref, w_ref, b_ref, o_ref, acc_ref):
        k = pl.program_id(2)

        @pl.when(k == 0)
        def _():
            acc_ref[...] = jnp.zeros_like(acc_ref)

        x = x_ref[...]
        w = w_ref[...]
        if use_bf16_mxu and x.dtype == jnp.float32:
            # Numerics-affecting fast path: bf16 MXU feed, f32 accumulation.
            x = x.astype(jnp.bfloat16)
            w = w.astype(jnp.bfloat16)
        acc_ref[...] += jnp.dot(x, w, preferred_element_type=jnp.float32)

        @pl.when(k == pl.num_programs(2) - 1)
        def _():
            res = acc_ref[...] + b_ref[...].astype(jnp.float32)
            if activation == "relu":
                res = jnp.maximum(res, 0.0)
            elif activation == "leaky_relu":
                res = jnp.where(res >= 0, res, negative_slope * res)
            o_ref[...] = res.astype(o_ref.dtype)

    return kernel


# --------------------------------------------------------------------------
# Tile selection (python ints only, runs at trace/setup time).
# --------------------------------------------------------------------------
def _choose_tiles(B, IN, OUT, dtype,
                  tile_b: int = 512, tile_n: int = 512, tile_k: int = 1024):
    row = _row_align(dtype)
    itemsize = jnp.dtype(dtype).itemsize

    Bp = _round_up(B, row)
    INp = _round_up(IN, 128)
    OUTp = _round_up(OUT, 128)

    tb = max(row, (min(tile_b, Bp) // row) * row)
    tn = max(128, (min(tile_n, OUTp) // 128) * 128)
    tk = max(128, (min(tile_k, INp) // 128) * 128)
    # One K step when the whole contraction fits the requested budget.
    if INp <= tile_k:
        tk = INp

    # v7x megacore: guarantee >= 2 blocks along the parallel axes when
    # possible so both TensorCores get work (harmless on v5e/v6e).
    if pl.cdiv(Bp, tb) == 1 and pl.cdiv(OUTp, tn) == 1 and OUTp >= 256:
        tn = max(128, ((OUTp // 2) // 128) * 128)

    def vmem_bytes(tb_, tn_, tk_):
        return (2 * tb_ * tk_ * itemsize      # x (double buffered)
                + 2 * tk_ * tn_ * itemsize    # w (double buffered)
                + 2 * tb_ * tn_ * itemsize    # out (double buffered)
                + 2 * tn_ * itemsize          # bias
                + tb_ * tn_ * 4)              # f32 accumulator scratch

    # Keep the working set under ~24 MiB: safe under v7x's 64 MiB physical
    # VMEM and leaves pipelining headroom everywhere.
    budget = 24 << 20
    while vmem_bytes(tb, tn, tk) > budget and tk > 256:
        tk = max(256, ((tk // 2) // 128) * 128)
    while vmem_bytes(tb, tn, tk) > budget and tn > 256:
        tn = max(256, ((tn // 2) // 128) * 128)
    while vmem_bytes(tb, tn, tk) > budget and tb > row:
        tb = max(row, ((tb // 2) // row) * row)

    return tb, tn, tk, vmem_bytes(tb, tn, tk)


# --------------------------------------------------------------------------
# One-time parameter preparation: transpose to [IN, OUT] and pad to tiles.
# Do this at parameter-load time, NOT per forward call.
# --------------------------------------------------------------------------
def prepare_linear_params(weight, bias, tn: int, tk: int):
    OUT, IN = weight.shape
    INp = _round_up(_round_up(IN, 128), tk)
    OUTp = _round_up(_round_up(OUT, 128), tn)
    w_t = weight.T  # [IN, OUT]
    if (INp, OUTp) != (IN, OUT):
        w_t = jnp.pad(w_t, ((0, INp - IN), (0, OUTp - OUT)))
    b = bias
    if OUTp != OUT:
        b = jnp.pad(b, (0, OUTp - OUT))
    return w_t, b.reshape(1, OUTp)


# --------------------------------------------------------------------------
# Hot-path call: x [B, IN] x prepared (w_t [INp, OUTp], b2 [1, OUTp]).
# --------------------------------------------------------------------------
@functools.partial(
    jax.jit,
    static_argnames=("activation", "negative_slope", "out_features",
                     "tb", "tn", "tk", "use_bf16_mxu", "extra_buffering"))
def linear_layer_prepared(x, w_t, b2, *, out_features: int,
                          activation: str = "relu",
                          negative_slope: float = 0.01,
                          tb: int, tn: int, tk: int,
                          use_bf16_mxu: bool = False,
                          extra_buffering: bool = False):
    B, IN = x.shape
    INp, OUTp = w_t.shape
    assert INp % tk == 0 and OUTp % tn == 0
    out_dtype = x.dtype

    Bp = _round_up(B, tb)
    if (Bp, INp) != (B, IN):
        x = jnp.pad(x, ((0, Bp - B), (0, INp - IN)))

    gb, gn, gk = Bp // tb, OUTp // tn, INp // tk
    grid = (gb, gn, gk)

    x_isz = jnp.dtype(x.dtype).itemsize
    w_isz = jnp.dtype(w_t.dtype).itemsize
    b_isz = jnp.dtype(b2.dtype).itemsize
    o_isz = jnp.dtype(out_dtype).itemsize

    # Deep buffering is only worth it when tiles are small (exposed DMA).
    if extra_buffering:
        x_spec = pl.BlockSpec((tb, tk), lambda b, n, k: (b, k),
                              pipeline_mode=pl.Buffered(3))
        w_spec = pl.BlockSpec((tk, tn), lambda b, n, k: (k, n),
                              pipeline_mode=pl.Buffered(3))
    else:
        x_spec = pl.BlockSpec((tb, tk), lambda b, n, k: (b, k))
        w_spec = pl.BlockSpec((tk, tn), lambda b, n, k: (k, n))

    nbuf = 3 if extra_buffering else 2
    vmem_est = (nbuf * tb * tk * x_isz + nbuf * tk * tn * w_isz
                + 2 * tb * tn * o_isz + 2 * tn * b_isz + tb * tn * 4)
    vmem_limit = min(48 << 20, max(32 << 20, int(vmem_est * 1.25) + (4 << 20)))

    # Streamed traffic (with refetch factors), not one pass per array.
    bytes_accessed = (Bp * INp * x_isz * gn        # x streamed once per N tile
                      + OUTp * INp * w_isz * gb    # w streamed once per B tile
                      + OUTp * b_isz * gb          # bias
                      + Bp * OUTp * o_isz)         # output written once

    out = pl.pallas_call(
        _make_linear_kernel(activation, negative_slope, use_bf16_mxu),
        out_shape=jax.ShapeDtypeStruct((Bp, OUTp), out_dtype),
        grid_spec=pltpu.PrefetchScalarGridSpec(
            num_scalar_prefetch=0,
            grid=grid,
            in_specs=[
                x_spec,                                          # x tile
                w_spec,                                          # w tile [IN, OUT]
                pl.BlockSpec((1, tn), lambda b, n, k: (0, n)),   # bias tile
            ],
            out_specs=pl.BlockSpec((tb, tn), lambda b, n, k: (b, n)),
            scratch_shapes=[pltpu.VMEM((tb, tn), jnp.float32)],
        ),
        compiler_params=pltpu.CompilerParams(
            dimension_semantics=("parallel", "parallel", "arbitrary"),
            vmem_limit_bytes=vmem_limit),
        cost_estimate=pl.CostEstimate(
            flops=2 * Bp * INp * OUTp,
            transcendentals=0,
            bytes_accessed=bytes_accessed),
    )(x, w_t, b2)

    return out[:B, :out_features]


# --------------------------------------------------------------------------
# Convenience wrapper taking the PyTorch [OUT, IN] weight layout directly.
# (For repeated calls with the same parameters, prefer doing
#  prepare_linear_params once and calling linear_layer_prepared.)
# --------------------------------------------------------------------------
def linear_layer(x, weight, bias, *, activation: str = "relu",
                 negative_slope: float = 0.01, use_bf16_mxu: bool = False,
                 tile_b: int = 512, tile_n: int = 512, tile_k: int = 1024,
                 extra_buffering: bool = False):
    B, IN = x.shape
    OUT, IN_w = weight.shape
    assert IN_w == IN, "weight shape must be [out_features, in_features]"
    tb, tn, tk, _ = _choose_tiles(B, IN, OUT, x.dtype, tile_b, tile_n, tile_k)
    w_t, b2 = prepare_linear_params(weight, bias, tn, tk)
    return linear_layer_prepared(
        x, w_t, b2, out_features=OUT, activation=activation,
        negative_slope=negative_slope, tb=tb, tn=tn, tk=tk,
        use_bf16_mxu=use_bf16_mxu, extra_buffering=extra_buffering)


if __name__ == "__main__":
    key = jax.random.PRNGKey(0)
    kx, kw, kb = jax.random.split(key, 3)

    # ---- Test 1: prepared-weight flow, relu, f32 ----
    B, IN, OUT = 8, 32, 64
    x = jax.random.normal(kx, (B, IN), dtype=jnp.float32)
    bound = 1.0 / (IN ** 0.5)
    weight = jax.random.uniform(kw, (OUT, IN), minval=-bound, maxval=bound,
                                dtype=jnp.float32)
    bias = jax.random.uniform(kb, (OUT,), minval=-bound, maxval=bound,
                              dtype=jnp.float32)

    tb, tn, tk, _ = _choose_tiles(B, IN, OUT, x.dtype)
    w_t, b2 = prepare_linear_params(weight, bias, tn, tk)  # once, at load time
    out = linear_layer_prepared(x, w_t, b2, out_features=OUT,
                                activation="relu", tb=tb, tn=tn, tk=tk)
    jax.block_until_ready(out)
    ref = jnp.maximum(x @ weight.T + bias, 0.0)
    assert out.shape == (B, OUT)
    assert jnp.allclose(out, ref, atol=1e-5, rtol=1e-5)

    # ---- Test 2: unaligned shapes, multi-step K reduction, leaky_relu ----
    B2, IN2, OUT2 = 17, 160, 192
    kx2, kw2, kb2 = jax.random.split(jax.random.PRNGKey(1), 3)
    x2 = jax.random.normal(kx2, (B2, IN2), dtype=jnp.float32)
    w2 = jax.random.normal(kw2, (OUT2, IN2), dtype=jnp.float32) * 0.05
    b2v = jax.random.normal(kb2, (OUT2,), dtype=jnp.float32) * 0.05
    out2 = linear_layer(x2, w2, b2v, activation="leaky_relu", tile_k=128)
    jax.block_until_ready(out2)
    y2 = x2 @ w2.T + b2v
    ref2 = jnp.where(y2 >= 0, y2, 0.01 * y2)
    assert out2.shape == (B2, OUT2)
    assert jnp.allclose(out2, ref2, atol=1e-4, rtol=1e-4)

    # ---- Test 3: bf16-MXU fast path (numerics-affecting option) ----
    out3 = linear_layer(x2, w2, b2v, activation="relu", use_bf16_mxu=True)
    jax.block_until_ready(out3)
    ref3 = jnp.maximum(x2 @ w2.T + b2v, 0.0)
    assert jnp.allclose(out3, ref3, atol=5e-2, rtol=5e-2)

    print("KERNEL_OK")
</pallas_src>

<mosaic_0001>
module attributes {stable_mosaic.version = 11 : i64} {
  func.func @kernel(%arg0: i32, %arg1: i32, %arg2: i32, %arg3: memref<8x128xf32, #tpu.memory_space<vmem>>, %arg4: memref<128x128xf32, #tpu.memory_space<vmem>>, %arg5: memref<1x128xf32, #tpu.memory_space<vmem>>, %arg6: memref<8x128xf32, #tpu.memory_space<vmem>>, %arg7: memref<8x128xf32, #tpu.memory_space<vmem>>) attributes {dimension_semantics = [#tpu.dimension_semantics<parallel>, #tpu.dimension_semantics<parallel>, #tpu.dimension_semantics<arbitrary>], iteration_bounds = array<i64: 1, 1, 1>, scalar_prefetch = 0 : i64, scratch_operands = 1 : i64, tpu.core_type = #tpu.core_type<tc>, window_params = [{transform_indices = @transform_0, window_bounds = array<i64: 8, 128>}, {transform_indices = @transform_1, window_bounds = array<i64: 128, 128>}, {transform_indices = @transform_2, window_bounds = array<i64: 1, 128>}, {transform_indices = @transform_3, window_bounds = array<i64: 8, 128>}]} {
    %c0_i32 = arith.constant 0 : i32
    %0 = arith.cmpi eq, %arg2, %c0_i32 : i32
    %1 = arith.extui %0 : i1 to i32
    %c0_i32_0 = arith.constant 0 : i32
    %2 = arith.cmpi ne, %1, %c0_i32_0 : i32
    scf.if %2 {
      %cst_10 = arith.constant 0.000000e+00 : f32
      %12 = vector.broadcast %cst_10 : f32 to vector<8x128xf32>
      %c0_11 = arith.constant 0 : index
      %c0_12 = arith.constant 0 : index
      %13 = vector.load %arg7[%c0_11, %c0_12] : memref<8x128xf32, #tpu.memory_space<vmem>>, vector<8x128xf32>
      tpu.vector_store %arg7[%c0_11, %c0_12], %12 {strides = array<i32>} : memref<8x128xf32, #tpu.memory_space<vmem>>, vector<8x128xf32>,
    } else {
    }
    %c0 = arith.constant 0 : index
    %c0_1 = arith.constant 0 : index
    %3 = vector.load %arg3[%c0, %c0_1] : memref<8x128xf32, #tpu.memory_space<vmem>>, vector<8x128xf32>
    %c0_2 = arith.constant 0 : index
    %c0_3 = arith.constant 0 : index
    %4 = vector.load %arg4[%c0_2, %c0_3] : memref<128x128xf32, #tpu.memory_space<vmem>>, vector<128x128xf32>
    %c0_4 = arith.constant 0 : index
    %c0_5 = arith.constant 0 : index
    %5 = vector.load %arg7[%c0_4, %c0_5] : memref<8x128xf32, #tpu.memory_space<vmem>>, vector<8x128xf32>
    %cst = arith.constant dense<0.000000e+00> : vector<8x128xf32>
    %6 = tpu.matmul %3, %4, %cst {dimension_numbers = #tpu.dot_dimension_numbers<[1], [0], [0], [1], [0, 0, 1, 1], [], []>} : vector<8x128xf32>, vector<128x128xf32>, vector<8x128xf32> -> vector<8x128xf32>
    %7 = arith.addf %5, %6 : vector<8x128xf32>
    %c0_6 = arith.constant 0 : index
    %c0_7 = arith.constant 0 : index
    %8 = vector.load %arg7[%c0_6, %c0_7] : memref<8x128xf32, #tpu.memory_space<vmem>>, vector<8x128xf32>
    tpu.vector_store %arg7[%c0_6, %c0_7], %7 {strides = array<i32>} : memref<8x128xf32, #tpu.memory_space<vmem>>, vector<8x128xf32>,
    %c0_i32_8 = arith.constant 0 : i32
    %9 = arith.cmpi eq, %arg2, %c0_i32_8 : i32
    %10 = arith.extui %9 : i1 to i32
    %c0_i32_9 = arith.constant 0 : i32
    %11 = arith.cmpi ne, %10, %c0_i32_9 : i32
    scf.if %11 {
      %c0_10 = arith.constant 0 : index
      %c0_11 = arith.constant 0 : index
      %12 = vector.load %arg7[%c0_10, %c0_11] : memref<8x128xf32, #tpu.memory_space<vmem>>, vector<8x128xf32>
      %c0_12 = arith.constant 0 : index
      %c0_13 = arith.constant 0 : index
      %13 = vector.load %arg5[%c0_12, %c0_13] : memref<1x128xf32, #tpu.memory_space<vmem>>, vector<1x128xf32>
      %14 = vector.broadcast %13 : vector<1x128xf32> to vector<8x128xf32>
      %15 = arith.addf %12, %14 : vector<8x128xf32>
      %cst_14 = arith.constant 0.000000e+00 : f32
      %16 = vector.broadcast %cst_14 : f32 to vector<8x128xf32>
      %17 = arith.maximumf %15, %16 : vector<8x128xf32>
      %c0_15 = arith.constant 0 : index
      %c0_16 = arith.constant 0 : index
      %18 = vector.load %arg6[%c0_15, %c0_16] : memref<8x128xf32, #tpu.memory_space<vmem>>, vector<8x128xf32>
      tpu.vector_store %arg6[%c0_15, %c0_16], %17 {strides = array<i32>} : memref<8x128xf32, #tpu.memory_space<vmem>>, vector<8x128xf32>,
    } else {
    }
    return
  }
  func.func @transform_0(%arg0: i32, %arg1: i32, %arg2: i32) -> (i32, i32) {
    %c0_i32 = arith.constant 0 : i32
    return %arg0, %arg2 : i32, i32
  }
  func.func @transform_1(%arg0: i32, %arg1: i32, %arg2: i32) -> (i32, i32) {
    %c0_i32 = arith.constant 0 : i32
    return %arg2, %arg1 : i32, i32
  }
  func.func @transform_2(%arg0: i32, %arg1: i32, %arg2: i32) -> (i32, i32) {
    %c0_i32 = arith.constant 0 : i32
    %c0_i32_0 = arith.constant 0 : i32
    return %c0_i32, %arg1 : i32, i32
  }
  func.func @transform_3(%arg0: i32, %arg1: i32, %arg2: i32) -> (i32, i32) {
    %c0_i32 = arith.constant 0 : i32
    return %arg0, %arg1 : i32, i32
  }
}

</mosaic_0001>

<bundles_post_ra>
// kernel: linear_layer_prepared.1
= control target key start
LH: loop header
LB: loop body
LE: loop exit
PB: predicated region body
PF: predicated region fallthrough
CT: control target
= control target key end

     0   :  { %8 = vsyncpa [#allocation4], 0  ;;  %s342_s0 = inlined_call_operand.vmem [shape: f32[8,128], index: 0, kind: input, shape index: {}]   ;;  %s343_s1 = inlined_call_operand.hbm [shape: f32[128,128], index: 1, kind: input, shape index: {}]   ;;  %s344_s2 = inlined_call_operand.vmem [shape: f32[1,128], index: 2, kind: input, shape index: {}]   ;;  %s345_s3 = inlined_call_operand.hbm [shape: f32[8,128], index: 3, kind: output, shape index: {}]  }
   0x1   :  { %9 = vsyncpa [#allocation5], 0  ;;  %s285_s12 = smov [#allocation3]   ;;  %s237_s16 = scalar_lea.hbm %s343_s1, 2048 }
   0x2   :  { %s17_s13 = sshll.u32 %s285_s12, 4  ;;  %p238_p0 = scmp.ne.s32.totalorder %s343_s1, %s237_s16  ;;  %s18_s13 = int_to_ptr.vmem [resolvable:$true] %s17_s13 }
   0x3   :  { %p241_p1 = scmp.lt.u32.totalorder %s237_s16, %s343_s1 }
   0x5   :  { %p243_p2 = pnand %p241_p1, %p238_p0 }
   0x7   :  { %246 = shalt.err (!%p243_p2)
}
   0x8   :  { %s247_s21 = scalar_lea.vmem %s18_s13, 2048  ;;  %p252_p4 = scmp.lt.s32.totalorder %s18_s13, %s18_s13 }
   0x9   :  { %p248_p3 = scmp.ne.s32.totalorder %s18_s13, %s247_s21  ;;  %p253_p5 = scmp.lt.s32.totalorder %s247_s21, %s247_s21 }
   0xb   :  { %p254_p6 = por %p253_p5, %p252_p4 }
   0xd   :  { %p255_p7 = pnand %p254_p6, %p248_p3 }
   0xf   :  { %258 = shalt.err (!%p255_p7)
}
  0x10   :  { %s286_s22 = smov 128   ;;  %s287_s23 = smov 8  }
  0x11   :  { %23 = dma.hbm_to_vmem [thread:$0]  %s343_s1, 2048, %s18_s13, [#allocation4], %s286_s22, %s286_s22, %s287_s23  }
  0x12   :  { %281 = dma.done.wait [#allocation4], 2048  }
  0x13   :  { %282 = vsyncadd [#allocation4], 4294965248  ;;  %v288_v0 = vmov 0.0|0.0   ;;  %vm289_vm0 = vmmov 0   ;;  %v290_v1 = vmov 0.0   ;;  %v35_v2 = vld [vmem:[#allocation3] sm:$0xff] }
  0x14   :  { %206 = vmatprep.subr.bf16.mxu0 %v288_v0  ;;  %203 = vmatprep.mubr.msk.f32.mxu0 %vm289_vm0, %v290_v1  ;;  %v36_v3 = vld [vmem:[#allocation3 + $0x8] sm:$0xff]  ;;  %v37_v4 = vld [vmem:[#allocation3 + $0x10] sm:$0xff]  ;;  %v38_v6 = vld [vmem:[#allocation3 + $0x18] sm:$0xff]  ;;  %s291_s29 = smov [#allocation6]  }
  0x15   :  { %v207_v5 = vpack.c.bf16 %v36_v3, %v35_v2  ;;  %v210_v7 = vpack.c.bf16 %v38_v6, %v37_v4  ;;  %v39_v8 = vld [vmem:[#allocation3 + $0x20] sm:$0xff]  ;;  %v40_v9 = vld [vmem:[#allocation3 + $0x28] sm:$0xff]  ;;  %v41_v11 = vld [vmem:[#allocation3 + $0x30] sm:$0xff]  ;;  %s144_s30 = sshll.u32 %s291_s29, 4  ;;  %s145_s30 = int_to_ptr.vmem [resolvable:$true] %s144_s30 }
  0x16   :  { %v213_v10 = vpack.c.bf16 %v40_v9, %v39_v8  ;;  %v42_v12 = vld [vmem:[#allocation3 + $0x38] sm:$0xff]  ;;  %v43_v14 = vld [vmem:[#allocation3 + $0x40] sm:$0xff]  ;;  %v44_v15 = vld [vmem:[#allocation3 + $0x48] sm:$0xff]  ;;  %s259_s4 = scalar_lea.vmem %s145_s30, 128  ;;  %p264_p9 = scmp.lt.s32.totalorder %s145_s30, %s145_s30 }
  0x17   :  { %208 = vmatpush3.bf16.msra.mxu0 %v207_v5  ;;  %v216_v13 = vpack.c.bf16 %v42_v12, %v41_v11  ;;  %v219_v16 = vpack.c.bf16 %v44_v15, %v43_v14  ;;  %v45_v17 = vld [vmem:[#allocation3 + $0x50] sm:$0xff]  ;;  %v46_v18 = vld [vmem:[#allocation3 + $0x58] sm:$0xff]  ;;  %v47_v20 = vld [vmem:[#allocation3 + $0x60] sm:$0xff]  ;;  %p260_p8 = scmp.ne.s32.totalorder %s145_s30, %s259_s4  ;;  %p265_p10 = scmp.lt.s32.totalorder %s259_s4, %s259_s4 }
  0x18   :  { %209 = vmatprep.subr.bf16.mxu0 %v288_v0  ;;  %v222_v19 = vpack.c.bf16 %v46_v18, %v45_v17  ;;  %v48_v21 = vld [vmem:[#allocation3 + $0x68] sm:$0xff]  ;;  %v49_v23 = vld [vmem:[#allocation3 + $0x70] sm:$0xff]  ;;  %v50_v24 = vld [vmem:[#allocation3 + $0x78] sm:$0xff] }
  0x19   :  { %v225_v22 = vpack.c.bf16 %v48_v21, %v47_v20  ;;  %v228_v25 = vpack.c.bf16 %v50_v24, %v49_v23  ;;  %v34_v26 = vld [vmem:[%s342_s0] sm:$0xff]  ;;  %p266_p11 = por %p265_p10, %p264_p9 }
  0x1a   :  { %v153_v27 = vld [vmem:[%s344_s2] ss:$0 sm:$0xff] }
  0x1b   :  { %211 = vmatpush3.bf16.msra.mxu0 %v210_v7  ;;  %p267_p12 = pnand %p266_p11, %p260_p8 }
  0x1c   :  { %212 = vmatprep.subr.bf16.mxu0 %v288_v0 }
  0x1f   :  { %214 = vmatpush3.bf16.msra.mxu0 %v213_v10 }
  0x20   :  { %215 = vmatprep.subr.bf16.mxu0 %v288_v0 }
  0x23   :  { %217 = vmatpush3.bf16.msra.mxu0 %v216_v13 }
  0x24   :  { %218 = vmatprep.subr.bf16.mxu0 %v288_v0 }
  0x27   :  { %220 = vmatpush3.bf16.msra.mxu0 %v219_v16 }
  0x28   :  { %221 = vmatprep.subr.bf16.mxu0 %v288_v0 }
  0x2b   :  { %223 = vmatpush3.bf16.msra.mxu0 %v222_v19 }
  0x2c   :  { %224 = vmatprep.subr.bf16.mxu0 %v288_v0 }
  0x2f   :  { %226 = vmatpush3.bf16.msra.mxu0 %v225_v22 }
  0x30   :  { %227 = vmatprep.subr.bf16.mxu0 %v288_v0 }
  0x33   :  { %229 = vmatpush3.bf16.msra.mxu0 %v228_v25 }
  0x36   :  { %204 = vmatmul.mubr.f32.vlgmr.msra.gmra.mrb[0].mxu0 %v34_v26 }
 0x109   :  { %v118_v28 = vpop.f32.mrb[0].mxu0 }
 0x10a   :  { %v135_v29 = vadd.f32 %v153_v27, %v118_v28  ;;  %v205_v30 = vpop.f32.mrb[1].mxu0 }
 0x10c   :  { %v136_v31 = vmax.f32 %v135_v29, 0.0 }
 0x10e   :  { %137 = vst [vmem:[#allocation6] sm:$0xff] %v136_v31 }
 0x10f   :  { %270 = shalt.err (!%p267_p12)
}
 0x110   :  { %s271_s6 = scalar_lea.hbm %s345_s3, 128 }
 0x111   :  { %p272_p13 = scmp.ne.s32.totalorder %s345_s3, %s271_s6  ;;  %p275_p0 = scmp.lt.u32.totalorder %s271_s6, %s345_s3 }
 0x113   :  { %p277_p1 = pnand %p275_p0, %p272_p13 }
 0x115   :  { %280 = shalt.err (!%p277_p1)
}
 0x116   :  { %147 = dma.vmem_to_hbm [thread:$0]  %s145_s30, 128, %s345_s3, [#allocation5]  }
 0x117   :  { %283 = dma.done.wait [#allocation5], 128  }
 0x118   :  { %284 = vsyncadd [#allocation5], 4294967168 }
 0x119   :  { %151 = vsyncpa [#allocation4], 1 }
 0x11a   :  { %152 = vsyncpa [#allocation5], 1 }

</bundles_post_ra>
